<compile_context>
chip_gen: v5e
topology: v5e:2x2
jax: 0.10.0
libtpu: 0.0.40
codegen_flags: <defaults>
</compile_context>

<pallas_src>
import math

import jax
import jax.numpy as jnp
from jax.experimental import pallas as pl
from jax.experimental.pallas import tpu as pltpu


def _hbm_copy_kernel(x_hbm_ref, o_hbm_ref, sem):
    # One direct HBM->HBM DMA of the whole (already target-shaped) tensor.
    # No grid, no VMEM round-trip, no vreg traffic.
    cp = pltpu.make_async_copy(x_hbm_ref, o_hbm_ref, sem)
    cp.start()
    cp.wait()


def _materialized_copy(x):
    """Identity copy of `x` into a fresh HBM buffer via a single DMA."""
    return pl.pallas_call(
        _hbm_copy_kernel,
        out_shape=jax.ShapeDtypeStruct(x.shape, x.dtype),
        in_specs=[pl.BlockSpec(memory_space=pl.ANY)],
        out_specs=pl.BlockSpec(memory_space=pl.ANY),
        scratch_shapes=[pltpu.SemaphoreType.DMA(())],
    )(x)


def reshape_forward(x, shape, *, materialize=False):
    """Pallas equivalent of Reshape(shape).forward(x).

    x           : jnp.ndarray, rank >= 1, leading dim is batch.
    shape       : tuple of ints; output is (x.shape[0], *shape).
    materialize : if False (default) the reshape is metadata-only, matching
                  PyTorch semantics and costing zero HBM traffic.  If True,
                  the result is written to a fresh HBM buffer by a single
                  HBM->HBM DMA issued from a Pallas kernel.
    """
    b = x.shape[0]
    feat = math.prod(x.shape[1:]) if x.ndim > 1 else 1
    tgt_feat = math.prod(shape)
    assert feat == tgt_feat, f"cannot reshape {x.shape} -> ({b}, {tuple(shape)})"
    out_shape = (b,) + tuple(shape)

    # Default / recommended path: metadata-only reshape (identical to the
    # PyTorch forward).  Also used for empty tensors.
    if not materialize or x.size == 0:
        return x.reshape(out_shape)

    # Explicitly requested materialized copy: target-shape the view (metadata
    # only), then one HBM->HBM DMA into a fresh buffer.
    return _materialized_copy(x.reshape(out_shape))


if __name__ == "__main__":
    key = jax.random.PRNGKey(0)
    # Small NCHW input, consistent with image-style data feeding the module.
    x = jax.random.normal(key, (2, 4, 16, 16), dtype=jnp.float32)

    # Reshape(shape=(16, 64)):  (2, 4, 16, 16) -> (2, 16, 64)
    target_shape = (16, 64)
    ref = x.reshape(x.shape[0], *target_shape)

    # 1) Default path (metadata-only reshape — the recommended way).
    out_meta = jax.block_until_ready(reshape_forward(x, target_shape))

    # 2) Explicit materialized copy — exercises the Pallas HBM->HBM DMA kernel.
    out_copy = jax.block_until_ready(
        reshape_forward(x, target_shape, materialize=True)
    )

    assert out_meta.shape == (2, 16, 64), out_meta.shape
    assert out_copy.shape == (2, 16, 64), out_copy.shape
    assert out_meta.dtype == x.dtype and out_copy.dtype == x.dtype
    assert bool(jnp.array_equal(out_meta, ref))
    assert bool(jnp.array_equal(out_copy, ref))

    print("KERNEL_OK")
</pallas_src>

<mosaic_0001>
module attributes {stable_mosaic.version = 11 : i64} {
  func.func @_hbm_copy_kernel(%arg0: memref<2x16x64xf32, #tpu.memory_space<any>>, %arg1: memref<2x16x64xf32, #tpu.memory_space<any>>, %arg2: memref<!tpu.dma_semaphore, #tpu.memory_space<semaphore_mem>>) attributes {dimension_semantics = [], scalar_prefetch = 0 : i64, scratch_operands = 1 : i64, tpu.core_type = #tpu.core_type<tc>} {
    tpu.enqueue_dma source(%arg0 : memref<2x16x64xf32, #tpu.memory_space<any>>) target(%arg1 : memref<2x16x64xf32, #tpu.memory_space<any>>) target_semaphore(%arg2 : memref<!tpu.dma_semaphore, #tpu.memory_space<semaphore_mem>>)
    tpu.wait_dma2 semaphore(%arg2 : memref<!tpu.dma_semaphore, #tpu.memory_space<semaphore_mem>>) src(%arg0 : memref<2x16x64xf32, #tpu.memory_space<any>>) dst(%arg1 : memref<2x16x64xf32, #tpu.memory_space<any>>)
    return
  }
}

</mosaic_0001>

<bundles_post_ra>
// kernel: tpu_custom_call.1
= control target key start
LH: loop header
LB: loop body
LE: loop exit
PB: predicated region body
PF: predicated region fallthrough
CT: control target
= control target key end

     0   :  { %s33_s12 = smov [#allocation2]   ;;  %s34_s13 = smov [#allocation3]   ;;  %s52_s0 = inlined_call_operand.hbm [shape: f32[2,16,64], index: 0, kind: input, shape index: {}]   ;;  %s53_s1 = inlined_call_operand.hbm [shape: f32[2,16,64], index: 1, kind: output, shape index: {}]  }
   0x1   :  { %s10_s8 = sshll.u32 %s52_s0, 4  ;;  %s12_s11 = sshll.u32 %s53_s1, 4  ;;  %s11_s8 = int_to_ptr.hbm [resolvable:$true] %s10_s8  ;;  %s13_s11 = int_to_ptr.hbm [resolvable:$true] %s12_s11 }
   0x2   :  { %s35_s14 = smov 0  }
   0x3   :  { %16 = dma.general %s11_s8, 512, %s13_s11, %s33_s12, %s34_s13, [#allocation4], %s35_s14, 0  }
   0x4   :  { %31 = dma.done.wait [#allocation2], 512 }
   0x5   :  { %32 = vsyncadd [#allocation2], 4294966784 }
   0x6   :  { %21 = vsyncmov [#allocation2] }
   0x9   :  { %s22_s15 = vpop.sfrf %21 }
   0xa   :  { %p27_p0 = scmp.ne.s32.totalorder %s22_s15, 0 }
   0xc   :  { %26 = shalt.err (%p27_p0)  }

</bundles_post_ra>
